<compile_context>
chip_gen: v6e
topology: v6e:2x2x1
jax: 0.10.0
libtpu: 0.0.40
codegen_flags: <defaults>
</compile_context>

<pallas_src>
import functools

import jax
import jax.numpy as jnp
from jax import lax
from jax.experimental import pallas as pl
from jax.experimental.pallas import tpu as pltpu

_CHUNK = 256      # lane chunk for the register-resident softmax
_SUBLANE = 8


def _round_up(x, m):
    return ((x + m - 1) // m) * m


def _router_kernel(x_ref, wqkv_ref, o_ref, qkv_ref, *, num_experts):
    """One grid step over TM tokens.

    x_ref:    (TM, H)    activations, natural token-major layout
    wqkv_ref: (3*Zp, H)  fused [Wq; Wk; Wv], experts padded to sublane mult.
    o_ref:    (Zp, TM)   router output, tokens on the lane axis
    qkv_ref:  (3*Zp, TM) f32 VMEM scratch holding the fused projection
    """
    zp, tm = o_ref.shape
    z = num_experts

    # Fused projection on the MXU, contracting on H so tokens stay on the
    # lane axis: (3Zp, H) . (TM, H)^T -> (3Zp, TM), f32 accumulate.
    qkv_ref[...] = lax.dot_general(
        wqkv_ref[...], x_ref[...],
        dimension_numbers=(((1,), (1,)), ((), ())),
        preferred_element_type=jnp.float32)

    def process(start, size):
        # Per-lane-chunk softmax: working set ~ (Z, Zp, size) f32 stays in
        # the vreg file instead of materializing (Z, Z, TM) temporaries.
        blk = qkv_ref[:, pl.ds(start, size)]            # (3Zp, size)
        q = blk[0 * zp:1 * zp, :]                       # (Zp, size)
        k = blk[1 * zp:1 * zp + z, :]                   # (Z,  size)
        v = blk[2 * zp:2 * zp + z, :]                   # (Z,  size)

        # scores[j, i, t] = q[i, t] * k[j, t]; the softmax reduction axis j
        # is the LEADING axis -> plain VPU max/add across resident vregs.
        scores = k[:, None, :] * q[None, :, :]          # (Z, Zp, size)
        m = jnp.max(scores, axis=0, keepdims=True)      # (1, Zp, size)
        e = jnp.exp(scores - m)                         # (Z, Zp, size)  EUP
        denom = jnp.sum(e, axis=0)                      # (Zp, size)
        num = jnp.sum(e * v[:, None, :], axis=0)        # (Zp, size)
        # Exact divide (approx reciprocal could flip near-tied top-k routing).
        o_ref[:, pl.ds(start, size)] = (num / denom).astype(o_ref.dtype)

    num_full = tm // _CHUNK
    rem = tm - num_full * _CHUNK
    if num_full > 0:
        def body(c, carry):
            start = pl.multiple_of(c * _CHUNK, _CHUNK)
            process(start, _CHUNK)
            return carry
        lax.fori_loop(0, num_full, body, 0, unroll=True)
    if rem > 0:
        process(num_full * _CHUNK, rem)


def _vmem_budget_and_limit():
    """Generation-dependent VMEM sizing (v5e/v6e: 128 MiB, v7x-class: 64 MiB)."""
    cap = 64 * 1024 * 1024
    try:
        info = pltpu.get_tpu_info()
        cap = int(getattr(info, "vmem_capacity_bytes", cap))
    except Exception:
        pass
    if cap >= 100 * 1024 * 1024:                       # v5e / v6e (128 MiB)
        return 80 * 1024 * 1024, 96 * 1024 * 1024
    return 22 * 1024 * 1024, 48 * 1024 * 1024          # v7x-class (64 MiB)


def _pick_token_tile(n, h, zp, x_itemsize, requested, vmem_budget):
    """Pick a lane-dense token tile that fits the per-step VMEM budget."""
    if requested is not None:
        tile = max(_CHUNK, _round_up(int(requested), _CHUNK))
        return n if tile >= n else tile
    if n <= 1024:
        return n                     # single block; block dims == array dims

    tile = 8192                      # large default amortizes ~0.35us/step

    def fits(t):
        streamed = 2 * t * h * x_itemsize      # double-buffered x tile
        scratch = t * 3 * zp * 4               # f32 qkv VMEM scratch
        out = 2 * t * zp * 4                   # double-buffered output tile
        return streamed + scratch + out <= vmem_budget

    while tile > _CHUNK and not fits(tile):
        tile //= 2
    # Keep >= 2 grid steps when there is enough work so the "parallel" token
    # axis can be megacore-sharded (v7x) and the last partial block is small.
    while tile > _CHUNK and pl.cdiv(n, tile) < 2:
        tile //= 2
    return tile


def parallel_attention_router(hidden_states, wq, wk, wv, *, token_tile=None,
                              return_experts_major=False):
    """Pallas TPU forward of ParallelAttention_router.

    hidden_states: (b, s, H); wq/wk/wv: (Z, H) torch nn.Linear-style weights.
    Returns (b*s, Z) float32 (module layout). With return_experts_major=True
    returns the kernel-native (Z, b*s) slab instead, skipping the final HBM
    transpose pass (downstream top-k over experts is layout-agnostic).
    """
    b, s, h = hidden_states.shape
    z = wq.shape[0]
    n = b * s
    zp = _round_up(z, _SUBLANE)

    # Natural token-major layout: a (TM, H) block spans the full last dim so
    # the input DMA is fully contiguous -- no host-side transpose / pad pass.
    x = hidden_states.reshape(n, h)

    # Fuse the three projections; pad experts to a sublane multiple so the
    # q/k/v row groups stay tile-aligned. Pad rows have zero weights; the
    # kernel only reduces over the first `z` k/v rows, so semantics are exact.
    def _pad(w):
        w = jnp.asarray(w)
        return jnp.pad(w, ((0, zp - z), (0, 0))) if zp != z else w
    w_qkv = jnp.concatenate([_pad(wq), _pad(wk), _pad(wv)], axis=0)
    w_qkv = w_qkv.astype(x.dtype)        # bf16 activations keep bf16 MXU path

    vmem_budget, vmem_limit = _vmem_budget_and_limit()
    tile = _pick_token_tile(n, h, zp, x.dtype.itemsize, token_tile, vmem_budget)
    grid = (pl.cdiv(n, tile),)

    out = pl.pallas_call(
        functools.partial(_router_kernel, num_experts=z),
        out_shape=jax.ShapeDtypeStruct((zp, n), jnp.float32),
        grid_spec=pltpu.PrefetchScalarGridSpec(
            num_scalar_prefetch=0,
            grid=grid,
            in_specs=[
                # Streaming activation tile. (If profiles ever show exposed
                # input DMA, add pipeline_mode=pl.Buffered(3) here.)
                pl.BlockSpec((tile, h), lambda i: (i, 0)),
                # Fused weights: constant index map -> stays VMEM-resident.
                pl.BlockSpec((3 * zp, h), lambda i: (0, 0)),
            ],
            out_specs=pl.BlockSpec((zp, tile), lambda i: (0, i)),
            scratch_shapes=[pltpu.VMEM((3 * zp, tile), jnp.float32)],
        ),
        compiler_params=pltpu.CompilerParams(
            dimension_semantics=("parallel",),
            vmem_limit_bytes=vmem_limit,
        ),
    )(x, w_qkv)

    if zp != z:
        out = out[:z]                    # drop padded expert rows
    if return_experts_major:
        return out                       # (Z, N) lane-dense slab
    return out.T                         # (b*s, Z): PyTorch module layout


def _reference(hidden_states, wq, wk, wv):
    # Pure-JAX reference mirroring the PyTorch forward exactly.
    b, s, h = hidden_states.shape
    z = wq.shape[0]
    q = (hidden_states @ wq.T).astype(jnp.float32).reshape(b, s, z, 1)
    k = (hidden_states @ wk.T).astype(jnp.float32).reshape(b, s, z, 1)
    v = (hidden_states @ wv.T).astype(jnp.float32).reshape(b, s, z, 1)
    attn = jnp.matmul(q, jnp.swapaxes(k, 2, 3))           # (b, s, z, z)
    attn = jax.nn.softmax(attn, axis=-1)
    out = jnp.matmul(attn, v)                             # (b, s, z, 1)
    return out.reshape(b * s, z)


if __name__ == "__main__":
    # Config consistent with the module: hidden_size=32, moe_num_experts=8.
    batch, seq, hidden_size, num_experts = 2, 8, 32, 8

    key = jax.random.PRNGKey(0)
    k_x, k_q, k_k, k_v, k_x2, k_x3 = jax.random.split(key, 6)

    hidden_states = jax.random.normal(k_x, (batch, seq, hidden_size), jnp.float32)
    bound = 1.0 / (hidden_size ** 0.5)
    wq = jax.random.uniform(k_q, (num_experts, hidden_size), jnp.float32, -bound, bound)
    wk = jax.random.uniform(k_k, (num_experts, hidden_size), jnp.float32, -bound, bound)
    wv = jax.random.uniform(k_v, (num_experts, hidden_size), jnp.float32, -bound, bound)

    # Tolerance covers MXU-vs-XLA f32 matmul precision-mode differences only;
    # the kernel itself no longer uses any approximate math.
    TOL = dict(atol=1e-2, rtol=1e-2)

    # Case 1: module-sized input (16 tokens -> one full block).
    out = jax.block_until_ready(parallel_attention_router(hidden_states, wq, wk, wv))
    ref = _reference(hidden_states, wq, wk, wv)
    assert out.shape == (batch * seq, num_experts)
    assert jnp.allclose(out, ref, **TOL), "mismatch vs reference (case 1)"

    # Case 2: token count not a multiple of 128, still a single full block.
    hs2 = jax.random.normal(k_x2, (2, 200, hidden_size), jnp.float32)
    out2 = jax.block_until_ready(parallel_attention_router(hs2, wq, wk, wv))
    ref2 = _reference(hs2, wq, wk, wv)
    assert out2.shape == (2 * 200, num_experts)
    assert jnp.allclose(out2, ref2, **TOL), "mismatch vs reference (case 2)"

    # Case 3: multi-step parallel grid + chunked softmax + partial last block.
    hs3 = jax.random.normal(k_x3, (2, 1300, hidden_size), jnp.float32)
    out3 = jax.block_until_ready(parallel_attention_router(hs3, wq, wk, wv))
    ref3 = _reference(hs3, wq, wk, wv)
    assert out3.shape == (2 * 1300, num_experts)
    assert jnp.allclose(out3, ref3, **TOL), "mismatch vs reference (case 3)"

    print("KERNEL_OK")
</pallas_src>

<mosaic_0001>
module attributes {stable_mosaic.version = 11 : i64} {
  func.func @_router_kernel(%arg0: i32, %arg1: memref<16x32xf32, #tpu.memory_space<vmem>>, %arg2: memref<24x32xf32, #tpu.memory_space<vmem>>, %arg3: memref<8x16xf32, #tpu.memory_space<vmem>>, %arg4: memref<24x16xf32, #tpu.memory_space<vmem>>) attributes {dimension_semantics = [#tpu.dimension_semantics<parallel>], iteration_bounds = array<i64: 1>, scalar_prefetch = 0 : i64, scratch_operands = 1 : i64, tpu.core_type = #tpu.core_type<tc>, window_params = [{transform_indices = @transform_0, window_bounds = array<i64: 16, 32>}, {pipeline_mode = #tpu.pipeline_mode<synchronous>, transform_indices = @transform_1, window_bounds = array<i64: 24, 32>}, {transform_indices = @transform_2, window_bounds = array<i64: 8, 16>}]} {
    %c0 = arith.constant 0 : index
    %c0_0 = arith.constant 0 : index
    %0 = vector.load %arg2[%c0, %c0_0] : memref<24x32xf32, #tpu.memory_space<vmem>>, vector<24x32xf32>
    %c0_1 = arith.constant 0 : index
    %c0_2 = arith.constant 0 : index
    %1 = vector.load %arg1[%c0_1, %c0_2] : memref<16x32xf32, #tpu.memory_space<vmem>>, vector<16x32xf32>
    %cst = arith.constant dense<0.000000e+00> : vector<24x16xf32>
    %2 = tpu.matmul %0, %1, %cst {dimension_numbers = #tpu.dot_dimension_numbers<[1], [1], [0], [0], [0, 0, 1, 0], [], []>} : vector<24x32xf32>, vector<16x32xf32>, vector<24x16xf32> -> vector<24x16xf32>
    %c0_3 = arith.constant 0 : index
    %c0_4 = arith.constant 0 : index
    %3 = vector.load %arg4[%c0_3, %c0_4] : memref<24x16xf32, #tpu.memory_space<vmem>>, vector<24x16xf32>
    tpu.vector_store %arg4[%c0_3, %c0_4], %2 {strides = array<i32>} : memref<24x16xf32, #tpu.memory_space<vmem>>, vector<24x16xf32>,
    %c0_5 = arith.constant 0 : index
    %c0_6 = arith.constant 0 : index
    %4 = vector.load %arg4[%c0_5, %c0_6] : memref<24x16xf32, #tpu.memory_space<vmem>>, vector<24x16xf32>
    %5 = vector.extract_strided_slice %4 {offsets = [0, 0], sizes = [8, 16], strides = [1, 1]} : vector<24x16xf32> to vector<8x16xf32>
    %6 = vector.extract_strided_slice %4 {offsets = [8, 0], sizes = [8, 16], strides = [1, 1]} : vector<24x16xf32> to vector<8x16xf32>
    %7 = vector.extract_strided_slice %4 {offsets = [16, 0], sizes = [8, 16], strides = [1, 1]} : vector<24x16xf32> to vector<8x16xf32>
    %8 = vector.shape_cast %6 : vector<8x16xf32> to vector<8x1x16xf32>
    %9 = vector.shape_cast %5 : vector<8x16xf32> to vector<1x8x16xf32>
    %10 = vector.broadcast %8 : vector<8x1x16xf32> to vector<8x8x16xf32>
    %11 = vector.broadcast %9 : vector<1x8x16xf32> to vector<8x8x16xf32>
    %12 = arith.mulf %10, %11 : vector<8x8x16xf32>
    %cst_7 = arith.constant dense<0xFF800000> : vector<8x16xf32>
    %13 = vector.multi_reduction <maximumf>, %12, %cst_7 [0] : vector<8x8x16xf32> to vector<8x16xf32>
    %14 = vector.shape_cast %13 : vector<8x16xf32> to vector<1x8x16xf32>
    %15 = vector.broadcast %14 : vector<1x8x16xf32> to vector<8x8x16xf32>
    %16 = arith.subf %12, %15 : vector<8x8x16xf32>
    %17 = math.exp %16 : vector<8x8x16xf32>
    %cst_8 = arith.constant dense<0.000000e+00> : vector<8x16xf32>
    %18 = vector.multi_reduction <add>, %17, %cst_8 [0] : vector<8x8x16xf32> to vector<8x16xf32>
    %19 = vector.shape_cast %7 : vector<8x16xf32> to vector<8x1x16xf32>
    %20 = vector.broadcast %19 : vector<8x1x16xf32> to vector<8x8x16xf32>
    %21 = arith.mulf %17, %20 : vector<8x8x16xf32>
    %cst_9 = arith.constant dense<0.000000e+00> : vector<8x16xf32>
    %22 = vector.multi_reduction <add>, %21, %cst_9 [0] : vector<8x8x16xf32> to vector<8x16xf32>
    %23 = arith.divf %22, %18 : vector<8x16xf32>
    %c0_10 = arith.constant 0 : index
    %c0_11 = arith.constant 0 : index
    %24 = vector.load %arg3[%c0_10, %c0_11] : memref<8x16xf32, #tpu.memory_space<vmem>>, vector<8x16xf32>
    tpu.vector_store %arg3[%c0_10, %c0_11], %23 {strides = array<i32>} : memref<8x16xf32, #tpu.memory_space<vmem>>, vector<8x16xf32>,
    return
  }
  func.func @transform_0(%arg0: i32) -> (i32, i32) {
    %c0_i32 = arith.constant 0 : i32
    %c0_i32_0 = arith.constant 0 : i32
    return %arg0, %c0_i32 : i32, i32
  }
  func.func @transform_1(%arg0: i32) -> (i32, i32) {
    %c0_i32 = arith.constant 0 : i32
    %c0_i32_0 = arith.constant 0 : i32
    %c0_i32_1 = arith.constant 0 : i32
    return %c0_i32, %c0_i32_0 : i32, i32
  }
  func.func @transform_2(%arg0: i32) -> (i32, i32) {
    %c0_i32 = arith.constant 0 : i32
    %c0_i32_0 = arith.constant 0 : i32
    return %c0_i32, %arg0 : i32, i32
  }
}

</mosaic_0001>

<bundles_post_ra>
// kernel: tpu_custom_call.1
= control target key start
LH: loop header
LB: loop body
LE: loop exit
PB: predicated region body
PF: predicated region fallthrough
CT: control target
= control target key end

     0   :  { %7 = vsyncpa [#allocation4], 0  ;;  %s648_s0 = inlined_call_operand.hbm [shape: f32[16,32], index: 0, kind: input, shape index: {}]   ;;  %s649_s1 = inlined_call_operand.hbm [shape: f32[24,32], index: 1, kind: input, shape index: {}]   ;;  %s650_s2 = inlined_call_operand.hbm [shape: f32[8,16], index: 2, kind: output, shape index: {}]  }
   0x1   :  { %8 = vsyncpa [#allocation7], 0 }
   0x2   :  { %9 = vsyncpa [#allocation5], 0  ;;  %s553_s9 = smov [#allocation3]  }
   0x3   :  { %s15_s10 = sshll.u32 %s553_s9, 4  ;;  %s16_s10 = int_to_ptr.vmem [resolvable:$true] %s15_s10 }
   0x4   :  { %s495_s11 = scalar_lea.vmem %s16_s10, 256  ;;  %p500_p1 = scmp.lt.s32.totalorder %s16_s10, %s16_s10 }
   0x5   :  { %p496_p0 = scmp.ne.s32.totalorder %s16_s10, %s495_s11  ;;  %p501_p2 = scmp.lt.s32.totalorder %s495_s11, %s495_s11 }
   0x7   :  { %p502_p3 = por %p501_p2, %p500_p1 }
   0x9   :  { %p503_p4 = pnand %p502_p3, %p496_p0 }
   0xb   :  { %506 = shalt.err (!%p503_p4)
}
   0xc   :  { %s554_s12 = smov 128   ;;  %s555_s13 = smov 8  }
   0xd   :  { %21 = dma.hbm_to_vmem [thread:$0]  %s648_s0, 256, %s16_s10, [#allocation4], %s554_s12, %s554_s12, %s555_s13  }
   0xe   :  { %s556_s16 = smov [#allocation6]  }
   0xf   :  { %s27_s17 = sshll.u32 %s556_s16, 4  ;;  %s28_s17 = int_to_ptr.vmem [resolvable:$true] %s27_s17 }
  0x10   :  { %s515_s18 = scalar_lea.vmem %s28_s17, 384  ;;  %p520_p6 = scmp.lt.s32.totalorder %s28_s17, %s28_s17 }
  0x11   :  { %p516_p5 = scmp.ne.s32.totalorder %s28_s17, %s515_s18  ;;  %p521_p7 = scmp.lt.s32.totalorder %s515_s18, %s515_s18 }
  0x13   :  { %p522_p8 = por %p521_p7, %p520_p6 }
  0x15   :  { %p523_p9 = pnand %p522_p8, %p516_p5 }
  0x17   :  { %526 = shalt.err (!%p523_p9)
}
  0x18   :  { %33 = dma.hbm_to_vmem [thread:$0]  %s649_s1, 384, %s28_s17, [#allocation7], %s554_s12, %s554_s12, %s555_s13  }
  0x19   :  { %547 = dma.done.wait [#allocation4], 256  }
  0x1a   :  { %548 = vsyncadd [#allocation4], 4294967040 }
  0x1b   :  { %549 = dma.done.wait [#allocation7], 384  }
  0x1c   :  { %550 = vsyncadd [#allocation7], 4294966912  ;;  %v557_v0 = vmov 0.0   ;;  %vm558_vm0 = vmmov 0   ;;  %vm45_vm1 = vcmask 261120   ;;  %v44_v1 = vld [vmem:[#allocation3 + $0x8] sm:$0xff]  ;;  %v153_v8 = vlaneseq }
  0x1d   :  { %455 = vmatprep.subr.mxu1 %v557_v0  ;;  %442 = vmatprep.subr.mxu0 %v557_v0  ;;  %v43_v2 = vld [vmem:[#allocation3] sm:$0xff]  ;;  %v41_v3 = vld [vmem:[#allocation6 + $0x8] sm:$0xff]  ;;  %v40_v4 = vld [vmem:[#allocation6] sm:$0xff]  ;;  %v559_v6 = vmov 1966171168   ;;  %vm141_vm2 = vcmask 130048  }
  0x1e   :  { %449 = vmatprep.mubr.msk.f32.mxu1 %vm558_vm0, %v557_v0  ;;  %446 = vmatprep.mubr.msk.f32.mxu0 %vm558_vm0, %v557_v0  ;;  %v42_v5 = vld [vmem:[#allocation6 + $0x10] sm:$0xff]  ;;  %v151_v7 = vunpack.c.l.s4 %v559_v6  ;;  %v154_v12 = vshrl.u32 %v153_v8, 7  ;;  %s560_s0 = smov [#allocation8]  }
  0x1f   :  { %457 = vmatpush3.xpose.msk.msra.mxu1 %vm45_vm1, %v44_v1  ;;  %443 = vmatpush3.xpose.msk.msra.mxu0 %vm45_vm1, %v44_v1  ;;  %s422_s1 = sshll.u32 %s560_s0, 4  ;;  %s423_s1 = int_to_ptr.vmem [resolvable:$true] %s422_s1 }
  0x20   :  { %456 = vmatprep.subr.mxu1 %v557_v0  ;;  %444 = vmatprep.subr.mxu0 %v557_v0  ;;  %v152_v11 = vunpack.c.0.s8 %v151_v7  ;;  %v591_v21 = vsub.s32 0, %v154_v12  ;;  %s527_s21 = scalar_lea.vmem %s423_s1, 128  ;;  %p532_p11 = scmp.lt.s32.totalorder %s423_s1, %s423_s1 }
  0x21   :  { %p528_p10 = scmp.ne.s32.totalorder %s423_s1, %s527_s21  ;;  %p533_p12 = scmp.lt.s32.totalorder %s527_s21, %s527_s21 }
  0x22   :  { %v587_v16 = vsub.s32 %v152_v11, %v154_v12 }
  0x23   :  { %458 = vmatpush3.xpose.msk.msra.mxu1 %vm45_vm1, %v43_v2  ;;  %445 = vmatpush3.xpose.msk.msra.mxu0 %vm45_vm1, %v43_v2  ;;  %p534_p13 = por %p533_p12, %p532_p11 }
  0x25   :  { %p535_p0 = pnand %p534_p13, %p528_p10 }
  0x26   :  { %450 = vmatmul.mubr.msk.f32.vlgmr.msra.gmra.mxu1 %vm45_vm1, %v41_v3  ;;  %447 = vmatmul.mubr.msk.f32.vlgmr.msra.gmra.mxu0 %vm45_vm1, %v40_v4 }
  0x27   :  { %452 = vmatprep.mubr.msk.f32.mxu1 %vm558_vm0, %v557_v0 }
  0x2a   :  { %453 = vmatmul.mubr.msk.f32.gmra.mxu1 %vm45_vm1, %v42_v5 }
  0xe6   :  { %v132_v9 = vpop.f32.mrf.mxu1  ;;  %v127_v10 = vpop.f32.mrf.mxu0 }
  0xe7   :  { %143 = vst.msk [vmem:[#allocation2 + $0x8] sm:$0xff] %vm141_vm2, %v132_v9  ;;  %142 = vst.msk [vmem:[#allocation2] sm:$0xff] %vm141_vm2, %v127_v10 }
  0xe8   :  { %v451_v13 = vpop.f32.mrf.mxu1  ;;  %v448_v14 = vpop.f32.mrf.mxu0 }
  0xea   :  { %v137_v15 = vpop.f32.mrf.mxu1 }
  0xeb   :  { %144 = vst.msk [vmem:[#allocation2 + $0x10] sm:$0xff] %vm141_vm2, %v137_v15 }
  0xec   :  { %v454_v17 = vpop.f32.mrf.mxu1 }
  0xee   :  { %v146_v18 = vld [vmem:[#allocation2 + $0x8] sm:$0xff]  ;;  %v145_v30 = vld [vmem:[#allocation2] sm:$0xff] }
  0xef   :  { %v149_v19 = vcombine.high %v146_v18, %v146_v18  ;;  %v156_v20 = vrot.slane %v146_v18, %v587_v16 }
  0xf1   :  { %v163_v22 = vrot.slane %v149_v19, %v587_v16  ;;  %v164_v23 = vcombine.high %v156_v20, %v156_v20  ;;  %v172_v24 = vrot.slane %v156_v20, %v587_v16 }
  0xf2   :  { %v147_v11 = vld [vmem:[#allocation2 + $0x10] sm:$0xff] }
  0xf3   :  { %v186_v25 = vrot.slane %v164_v23, %v587_v16  ;;  %v194_v26 = vcombine.high %v172_v24, %v172_v24  ;;  %v165_v27 = vcombine.high %v163_v22, %v163_v22  ;;  %v201_v28 = vrot.slane %v172_v24, %v591_v21 }
  0xf4   :  { %v179_v29 = vrot.slane %v163_v22, %v587_v16  ;;  %v308_v14 = vrot.slane %v147_v11, %v587_v16 }
  0xf5   :  { %v193_v31 = vrot.slane %v165_v27, %v587_v16  ;;  %v196_v32 = vcombine.high %v186_v25, %v186_v25  ;;  %v205_v33 = vrot.slane %v186_v25, %v591_v21  ;;  %v209_v34 = vrot.slane %v194_v26, %v591_v21 }
  0xf6   :  { %v195_v35 = vcombine.high %v179_v29, %v179_v29  ;;  %v217_v36 = vrot.slane %v179_v29, %v591_v21  ;;  %v238_v42 = vmul.f32 %v201_v28, %v145_v30  ;;  %v316_v19 = vcombine.high %v308_v14, %v308_v14 }
  0xf7   :  { %v197_v37 = vcombine.high %v193_v31, %v193_v31  ;;  %v213_v38 = vrot.slane %v196_v32, %v591_v21  ;;  %v221_v39 = vrot.slane %v193_v31, %v591_v21  ;;  %v239_v40 = vmul.f32 %v205_v33, %v145_v30 }
  0xf8   :  { %v225_v41 = vrot.slane %v195_v35, %v591_v21  ;;  %v242_v43 = vmul.f32 %v217_v36, %v145_v30  ;;  %v240_v45 = vmul.f32 %v209_v34, %v145_v30  ;;  %v246_v55 = vsel %vm141_vm2, %v238_v42, -inf }
  0xf9   :  { %v229_v44 = vrot.slane %v197_v37, %v591_v21  ;;  %v241_v46 = vmul.f32 %v213_v38, %v145_v30  ;;  %v243_v47 = vmul.f32 %v221_v39, %v145_v30  ;;  %v247_v50 = vsel %vm141_vm2, %v239_v40, -inf }
  0xfa   :  { %v244_v48 = vmul.f32 %v225_v41, %v145_v30  ;;  %v250_v51 = vsel %vm141_vm2, %v242_v43, -inf  ;;  %v248_v56 = vsel %vm141_vm2, %v240_v45, -inf  ;;  %v324_v20 = vrot.slane %v308_v14, %v587_v16 }
  0xfb   :  { %v245_v49 = vmul.f32 %v229_v44, %v145_v30  ;;  %v252_v52 = vsel %vm141_vm2, %v243_v47, -inf  ;;  %v249_v57 = vsel %vm141_vm2, %v241_v46, -inf  ;;  %v251_v59 = vmax.f32 %v246_v55, %v250_v51 }
  0xfc   :  { %v253_v53 = vmax.f32 %v247_v50, %v252_v52  ;;  %v254_v54 = vsel %vm141_vm2, %v244_v48, -inf  ;;  %v338_v23 = vrot.slane %v316_v19, %v587_v16  ;;  %v346_v24 = vcombine.high %v324_v20, %v324_v20 }
  0xfd   :  { %v256_v58 = vsel %vm141_vm2, %v245_v49, -inf  ;;  %v255_v60 = vmax.f32 %v248_v56, %v254_v54  ;;  %v353_v25 = vrot.slane %v324_v20, %v591_v21  ;;  %v301_v26 = vcombine.high %v147_v11, %v147_v11 }
  0xfe   :  { %v257_v61 = vmax.f32 %v249_v57, %v256_v58  ;;  %v258_v62 = vmax.f32 %v251_v59, %v253_v53  ;;  %v357_v27 = vrot.slane %v338_v23, %v591_v21  ;;  %v348_v29 = vcombine.high %v338_v23, %v338_v23 }
  0xff   :  { %v361_v30 = vrot.slane %v346_v24, %v591_v21  ;;  %v315_v36 = vrot.slane %v301_v26, %v587_v16 }
 0x100   :  { %v259_v63 = vmax.f32 %v255_v60, %v257_v61 }
 0x101   :  { %v331_v50 = vrot.slane %v315_v36, %v587_v16 }
 0x102   :  { %v260_v0 = vmax.f32 %v258_v62, %v259_v63 }
 0x103   :  { %v369_v54 = vrot.slane %v331_v50, %v591_v21 }
 0x104   :  { %v261_v1 = vsub.f32 %v238_v42, %v260_v0  ;;  %v262_v2 = vsub.f32 %v239_v40, %v260_v0  ;;  %v263_v3 = vsub.f32 %v240_v45, %v260_v0  ;;  %v264_v4 = vsub.f32 %v241_v46, %v260_v0 }
 0x105   :  { %v265_v5 = vsub.f32 %v242_v43, %v260_v0  ;;  %v266_v9 = vsub.f32 %v243_v47, %v260_v0  ;;  %v267_v12 = vsub.f32 %v244_v48, %v260_v0  ;;  %v268_v15 = vsub.f32 %v245_v49, %v260_v0 }
 0x106   :  { %v269_v6 = vmul.f32 1.442695, %v261_v1  ;;  %v271_v7 = vmul.f32 1.442695, %v262_v2  ;;  %v273_v8 = vmul.f32 1.442695, %v263_v3  ;;  %v365_v42 = vrot.slane %v348_v29, %v591_v21 }
 0x107   :  { %v275_v10 = vmul.f32 1.442695, %v264_v4  ;;  %v277_v13 = vmul.f32 1.442695, %v265_v5  ;;  %v279_v17 = vmul.f32 1.442695, %v266_v9  ;;  %v317_v49 = vcombine.high %v315_v36, %v315_v36 }
 0x108   :  { %469 = vpow2.f32 %v269_v6  ;;  %v281_v18 = vmul.f32 1.442695, %v267_v12  ;;  %v283_v22 = vmul.f32 1.442695, %v268_v15  ;;  %v347_v0 = vcombine.high %v331_v50, %v331_v50 }
 0x109   :  { %471 = vpow2.f32 %v271_v7  ;;  %v345_v61 = vrot.slane %v317_v49, %v587_v16 }
 0x10a   :  { %473 = vpow2.f32 %v273_v8 }
 0x10b   :  { %475 = vpow2.f32 %v275_v10  ;;  %v373_v2 = vrot.slane %v345_v61, %v591_v21  ;;  %v349_v9 = vcombine.high %v345_v61, %v345_v61  ;;  %v377_v10 = vrot.slane %v347_v0, %v591_v21 }
 0x10c   :  { %477 = vpow2.f32 %v277_v13 }
 0x10d   :  { %479 = vpow2.f32 %v279_v17  ;;  %v381_v13 = vrot.slane %v349_v9, %v591_v21 }
 0x10e   :  { %481 = vpow2.f32 %v281_v18 }
 0x10f   :  { %483 = vpow2.f32 %v283_v22 }
 0x115   :  { %v470_v28 = vpop.eup %469 }
 0x116   :  { %v472_v31 = vpop.eup %471  ;;  %v285_v32 = vsel %vm141_vm2, %v470_v28, 0.0  ;;  %v390_v33 = vmul.f32 %v470_v28, %v353_v25 }
 0x117   :  { %v474_v34 = vpop.eup %473  ;;  %v286_v35 = vsel %vm141_vm2, %v472_v31, 0.0  ;;  %v391_v37 = vmul.f32 %v472_v31, %v357_v27 }
 0x118   :  { %v476_v38 = vpop.eup %475  ;;  %v287_v39 = vadd.f32 %v286_v35, %v285_v32  ;;  %v398_v40 = vsel %vm141_vm2, %v390_v33, 0.0  ;;  %v288_v41 = vsel %vm141_vm2, %v474_v34, 0.0  ;;  %v392_v43 = vmul.f32 %v474_v34, %v361_v30 }
 0x119   :  { %v399_v44 = vsel %vm141_vm2, %v391_v37, 0.0  ;;  %v478_v45 = vpop.eup %477  ;;  %v290_v48 = vsel %vm141_vm2, %v476_v38, 0.0  ;;  %v393_v55 = vmul.f32 %v476_v38, %v365_v42 }
 0x11a   :  { %v289_v46 = vadd.f32 %v288_v41, %v287_v39  ;;  %v400_v47 = vadd.f32 %v399_v44, %v398_v40  ;;  %v480_v51 = vpop.eup %479  ;;  %v292_v53 = vsel %vm141_vm2, %v478_v45, 0.0  ;;  %v401_v56 = vsel %vm141_vm2, %v392_v43, 0.0 }
 0x11b   :  { %v482_v57 = vpop.eup %481  ;;  %v294_v60 = vsel %vm141_vm2, %v480_v51, 0.0  ;;  %v394_v3 = vmul.f32 %v478_v45, %v369_v54  ;;  %v403_v4 = vsel %vm141_vm2, %v393_v55, 0.0  ;;  %v395_v11 = vmul.f32 %v480_v51, %v373_v2 }
 0x11c   :  { %v291_v52 = vadd.f32 %v290_v48, %v289_v46  ;;  %v402_v59 = vadd.f32 %v401_v56, %v400_v47  ;;  %v484_v62 = vpop.eup %483  ;;  %v296_v1 = vsel %vm141_vm2, %v482_v57, 0.0  ;;  %v396_v14 = vmul.f32 %v482_v57, %v377_v10 }
 0x11d   :  { %v298_v7 = vsel %vm141_vm2, %v484_v62, 0.0  ;;  %v405_v16 = vsel %vm141_vm2, %v394_v3, 0.0  ;;  %v407_v15 = vsel %vm141_vm2, %v395_v11, 0.0  ;;  %v397_v18 = vmul.f32 %v484_v62, %v381_v13 }
 0x11e   :  { %v293_v58 = vadd.f32 %v292_v53, %v291_v52  ;;  %v404_v6 = vadd.f32 %v403_v4, %v402_v59  ;;  %v409_v19 = vsel %vm141_vm2, %v396_v14, 0.0 }
 0x11f   :  { %v411_v22 = vsel %vm141_vm2, %v397_v18, 0.0 }
 0x120   :  { %v295_v63 = vadd.f32 %v294_v60, %v293_v58  ;;  %v406_v12 = vadd.f32 %v405_v16, %v404_v6 }
 0x122   :  { %v297_v5 = vadd.f32 %v296_v1, %v295_v63  ;;  %v408_v17 = vadd.f32 %v407_v15, %v406_v12 }
 0x124   :  { %v299_v8 = vadd.f32 %v298_v7, %v297_v5  ;;  %v410_v20 = vadd.f32 %v409_v19, %v408_v17 }
 0x126   :  { %485 = vrcp.f32 %v299_v8  ;;  %v412_v23 = vadd.f32 %v411_v22, %v410_v20 }
 0x133   :  { %v486_v24 = vpop.eup %485 }
 0x134   :  { %v414_v25 = vmul.f32 %v486_v24, %v412_v23 }
 0x136   :  { %415 = vst.msk [vmem:[#allocation8] sm:$0xff] %vm141_vm2, %v414_v25 }
 0x137   :  { %538 = shalt.err (!%p535_p0)
}
 0x138   :  { %425 = dma.vmem_to_hbm [thread:$0]  %s423_s1, 128, %s650_s2, [#allocation5]  }
 0x139   :  { %551 = dma.done.wait [#allocation5], 128  }
 0x13a   :  { %552 = vsyncadd [#allocation5], 4294967168 }
 0x13b   :  { %429 = vsyncpa [#allocation4], 1 }
 0x13c   :  { %430 = vsyncpa [#allocation7], 1 }
 0x13d   :  { %431 = vsyncpa [#allocation5], 1 }

</bundles_post_ra>
